<compile_context>
chip_gen: v6e
topology: v6e:2x2x1
jax: 0.10.0
libtpu: 0.0.40
codegen_flags: <defaults>
</compile_context>

<pallas_src>
import math
import jax
import jax.numpy as jnp
from jax.experimental import pallas as pl
from jax.experimental.pallas import tpu as pltpu


def _se_kernel(x_ref, w_in_ref, b_in_ref, w_out_ref, b_out_ref, o_ref):
    # x_ref: (Bt, C, HW) f32 block of batch elements.
    hw = x_ref.shape[-1]
    C = x_ref.shape[1]

    # AdaptiveAvgPool2d(1): mean over spatial -> (Bt, C)
    a = jnp.sum(x_ref[...], axis=-1) * (1.0 / hw)

    # Fused FC branches (2 dots + 1 relu + 1 tanh instead of 4 + 2 + 2).
    h = jnp.maximum(
        jnp.dot(a, w_in_ref[...], preferred_element_type=jnp.float32)
        + b_in_ref[...], 0.0)                                     # (Bt, 2Hd)
    yz = jnp.tanh(
        jnp.dot(h, w_out_ref[...], preferred_element_type=jnp.float32)
        + b_out_ref[...])                                         # (Bt, 2C)
    y = yz[:, :C]            # fc1 branch output
    z = yz[:, C:]            # fc2 branch output

    # out = x * y + z, y/z broadcast over spatial. Re-read the VMEM ref (cheap:
    # 3 vld slots/cycle) so vreg pressure stays flat; single fused store.
    o_ref[...] = x_ref[...] * y[:, :, None] + z[:, :, None]


def _pick_batch_tile(B, C, HW, target_bytes=4 << 20):
    """Largest divisor of B whose (Bt, C, HW) f32 block stays <= ~4 MiB."""
    per_batch = C * HW * 4
    bt = 1
    for d in range(1, B + 1):
        if B % d == 0 and d * per_batch <= target_bytes:
            bt = d
    return bt


def se_layer_addmul(x_nchw, fused):
    """x_nchw: (B, C, H, W) float32. fused: dict from fuse_params()."""
    B, C, H, W = x_nchw.shape
    HW = H * W
    x = x_nchw.reshape(B, C, HW)

    Bt = _pick_batch_tile(B, C, HW)
    grid = (B // Bt,)

    block_bytes = Bt * C * HW * 4
    weight_bytes = 4 * (fused["w_in"].size + fused["b_in"].size
                        + fused["w_out"].size + fused["b_out"].size)
    # in + out blocks double-buffered + (double-buffered) weights + margin,
    # kept under ~48 MiB so the same config compiles on v7x (64 MiB VMEM).
    vmem_limit = int(min(48 << 20,
                         max(32 << 20,
                             4 * block_bytes + 4 * weight_bytes + (4 << 20))))

    def full(shape):
        return pl.BlockSpec(shape, lambda b: (0,) * len(shape))

    out = pl.pallas_call(
        _se_kernel,
        out_shape=jax.ShapeDtypeStruct((B, C, HW), x.dtype),
        grid_spec=pltpu.PrefetchScalarGridSpec(
            num_scalar_prefetch=0,
            grid=grid,
            in_specs=[
                pl.BlockSpec((Bt, C, HW), lambda b: (b, 0, 0)),   # x block
                full(fused["w_in"].shape), full(fused["b_in"].shape),
                full(fused["w_out"].shape), full(fused["b_out"].shape),
            ],
            out_specs=pl.BlockSpec((Bt, C, HW), lambda b: (b, 0, 0)),
        ),
        compiler_params=pltpu.CompilerParams(
            dimension_semantics=("parallel",),
            vmem_limit_bytes=vmem_limit),
    )(x, fused["w_in"], fused["b_in"], fused["w_out"], fused["b_out"])

    return out.reshape(B, C, H, W)


def init_params(key, channel, reduction=16):
    """nn.Linear-style init. Weights stored as (in_features, out_features)."""
    hidden = math.floor(channel / reduction)
    keys = jax.random.split(key, 8)

    def lin(kw, kb, fan_in, fan_out):
        bound = 1.0 / math.sqrt(fan_in)
        w = jax.random.uniform(kw, (fan_in, fan_out), jnp.float32, -bound, bound)
        b = jax.random.uniform(kb, (1, fan_out), jnp.float32, -bound, bound)
        return w, b

    w1, b1 = lin(keys[0], keys[1], channel, hidden)
    w2, b2 = lin(keys[2], keys[3], hidden, channel)
    w3, b3 = lin(keys[4], keys[5], channel, hidden)
    w4, b4 = lin(keys[6], keys[7], hidden, channel)
    return dict(w1=w1, b1=b1, w2=w2, b2=b2, w3=w3, b3=b3, w4=w4, b4=b4)


def fuse_params(p):
    """Merge the two FC branches into two wide matmuls (host-side, one time)."""
    C, Hd = p["w1"].shape
    w_in = jnp.concatenate([p["w1"], p["w3"]], axis=1)            # (C, 2Hd)
    b_in = jnp.concatenate([p["b1"], p["b3"]], axis=1)            # (1, 2Hd)
    w_out = jnp.zeros((2 * Hd, 2 * C), jnp.float32)
    w_out = w_out.at[:Hd, :C].set(p["w2"]).at[Hd:, C:].set(p["w4"])  # block-diag
    b_out = jnp.concatenate([p["b2"], p["b4"]], axis=1)           # (1, 2C)
    return dict(w_in=w_in, b_in=b_in, w_out=w_out, b_out=b_out)


def _reference(x, p):
    a = jnp.mean(x, axis=(2, 3))                                  # (B, C)
    y = jnp.tanh(jnp.maximum(a @ p["w1"] + p["b1"], 0.0) @ p["w2"] + p["b2"])
    z = jnp.tanh(jnp.maximum(a @ p["w3"] + p["b3"], 0.0) @ p["w4"] + p["b4"])
    return x * y[:, :, None, None] + z[:, :, None, None]


if __name__ == "__main__":
    key = jax.random.PRNGKey(0)
    kx, kp = jax.random.split(key)

    B, C, H, W = 2, 32, 16, 16          # channel=32, reduction=16 -> hidden=2
    x = jax.random.normal(kx, (B, C, H, W), jnp.float32)
    params = init_params(kp, C, reduction=16)
    fused = fuse_params(params)

    out = se_layer_addmul(x, fused)
    out = jax.block_until_ready(out)

    ref = _reference(x, params)
    assert out.shape == (B, C, H, W)
    assert jnp.allclose(out, ref, atol=1e-5, rtol=1e-5), "mismatch vs reference"

    print("KERNEL_OK")
</pallas_src>

<mosaic_0001>
module attributes {stable_mosaic.version = 11 : i64} {
  func.func @_se_kernel(%arg0: i32, %arg1: memref<2x32x256xf32, #tpu.memory_space<vmem>>, %arg2: memref<32x4xf32, #tpu.memory_space<vmem>>, %arg3: memref<1x4xf32, #tpu.memory_space<vmem>>, %arg4: memref<4x64xf32, #tpu.memory_space<vmem>>, %arg5: memref<1x64xf32, #tpu.memory_space<vmem>>, %arg6: memref<2x32x256xf32, #tpu.memory_space<vmem>>) attributes {dimension_semantics = [#tpu.dimension_semantics<parallel>], iteration_bounds = array<i64: 1>, scalar_prefetch = 0 : i64, scratch_operands = 0 : i64, tpu.core_type = #tpu.core_type<tc>, window_params = [{transform_indices = @transform_0, window_bounds = array<i64: 2, 32, 256>}, {pipeline_mode = #tpu.pipeline_mode<synchronous>, transform_indices = @transform_1, window_bounds = array<i64: 32, 4>}, {pipeline_mode = #tpu.pipeline_mode<synchronous>, transform_indices = @transform_2, window_bounds = array<i64: 1, 4>}, {pipeline_mode = #tpu.pipeline_mode<synchronous>, transform_indices = @transform_3, window_bounds = array<i64: 4, 64>}, {pipeline_mode = #tpu.pipeline_mode<synchronous>, transform_indices = @transform_4, window_bounds = array<i64: 1, 64>}, {transform_indices = @transform_5, window_bounds = array<i64: 2, 32, 256>}]} {
    %c0 = arith.constant 0 : index
    %c0_0 = arith.constant 0 : index
    %c0_1 = arith.constant 0 : index
    %0 = vector.load %arg1[%c0, %c0_0, %c0_1] : memref<2x32x256xf32, #tpu.memory_space<vmem>>, vector<2x32x256xf32>
    %cst = arith.constant dense<0.000000e+00> : vector<2x32xf32>
    %1 = vector.multi_reduction <add>, %0, %cst [2] : vector<2x32x256xf32> to vector<2x32xf32>
    %cst_2 = arith.constant 3.906250e-03 : f32
    %2 = vector.broadcast %cst_2 : f32 to vector<2x32xf32>
    %3 = arith.mulf %1, %2 : vector<2x32xf32>
    %c0_3 = arith.constant 0 : index
    %c0_4 = arith.constant 0 : index
    %4 = vector.load %arg2[%c0_3, %c0_4] : memref<32x4xf32, #tpu.memory_space<vmem>>, vector<32x4xf32>
    %cst_5 = arith.constant dense<0.000000e+00> : vector<2x4xf32>
    %5 = tpu.matmul %3, %4, %cst_5 {dimension_numbers = #tpu.dot_dimension_numbers<[1], [0], [0], [1], [0, 0, 1, 1], [], []>} : vector<2x32xf32>, vector<32x4xf32>, vector<2x4xf32> -> vector<2x4xf32>
    %c0_6 = arith.constant 0 : index
    %c0_7 = arith.constant 0 : index
    %6 = vector.load %arg3[%c0_6, %c0_7] : memref<1x4xf32, #tpu.memory_space<vmem>>, vector<1x4xf32>
    %7 = vector.broadcast %6 : vector<1x4xf32> to vector<2x4xf32>
    %8 = arith.addf %5, %7 : vector<2x4xf32>
    %cst_8 = arith.constant 0.000000e+00 : f32
    %9 = vector.broadcast %cst_8 : f32 to vector<2x4xf32>
    %10 = arith.maximumf %8, %9 : vector<2x4xf32>
    %c0_9 = arith.constant 0 : index
    %c0_10 = arith.constant 0 : index
    %11 = vector.load %arg4[%c0_9, %c0_10] : memref<4x64xf32, #tpu.memory_space<vmem>>, vector<4x64xf32>
    %cst_11 = arith.constant dense<0.000000e+00> : vector<2x64xf32>
    %12 = tpu.matmul %10, %11, %cst_11 {dimension_numbers = #tpu.dot_dimension_numbers<[1], [0], [0], [1], [0, 0, 1, 1], [], []>} : vector<2x4xf32>, vector<4x64xf32>, vector<2x64xf32> -> vector<2x64xf32>
    %c0_12 = arith.constant 0 : index
    %c0_13 = arith.constant 0 : index
    %13 = vector.load %arg5[%c0_12, %c0_13] : memref<1x64xf32, #tpu.memory_space<vmem>>, vector<1x64xf32>
    %14 = vector.broadcast %13 : vector<1x64xf32> to vector<2x64xf32>
    %15 = arith.addf %12, %14 : vector<2x64xf32>
    %16 = math.tanh %15 : vector<2x64xf32>
    %17 = vector.extract_strided_slice %16 {offsets = [0, 0], sizes = [2, 32], strides = [1, 1]} : vector<2x64xf32> to vector<2x32xf32>
    %18 = vector.extract_strided_slice %16 {offsets = [0, 32], sizes = [2, 32], strides = [1, 1]} : vector<2x64xf32> to vector<2x32xf32>
    %c0_14 = arith.constant 0 : index
    %c0_15 = arith.constant 0 : index
    %c0_16 = arith.constant 0 : index
    %19 = vector.load %arg1[%c0_14, %c0_15, %c0_16] : memref<2x32x256xf32, #tpu.memory_space<vmem>>, vector<2x32x256xf32>
    %20 = vector.shape_cast %17 : vector<2x32xf32> to vector<2x32x1xf32>
    %21 = vector.broadcast %20 : vector<2x32x1xf32> to vector<2x32x256xf32>
    %22 = arith.mulf %19, %21 : vector<2x32x256xf32>
    %23 = vector.shape_cast %18 : vector<2x32xf32> to vector<2x32x1xf32>
    %24 = vector.broadcast %23 : vector<2x32x1xf32> to vector<2x32x256xf32>
    %25 = arith.addf %22, %24 : vector<2x32x256xf32>
    %c0_17 = arith.constant 0 : index
    %c0_18 = arith.constant 0 : index
    %c0_19 = arith.constant 0 : index
    %26 = vector.load %arg6[%c0_17, %c0_18, %c0_19] : memref<2x32x256xf32, #tpu.memory_space<vmem>>, vector<2x32x256xf32>
    tpu.vector_store %arg6[%c0_17, %c0_18, %c0_19], %25 {strides = array<i32>} : memref<2x32x256xf32, #tpu.memory_space<vmem>>, vector<2x32x256xf32>,
    return
  }
  func.func @transform_0(%arg0: i32) -> (i32, i32, i32) {
    %c0_i32 = arith.constant 0 : i32
    %c0_i32_0 = arith.constant 0 : i32
    %c0_i32_1 = arith.constant 0 : i32
    return %arg0, %c0_i32, %c0_i32_0 : i32, i32, i32
  }
  func.func @transform_1(%arg0: i32) -> (i32, i32) {
    %c0_i32 = arith.constant 0 : i32
    %c0_i32_0 = arith.constant 0 : i32
    %c0_i32_1 = arith.constant 0 : i32
    return %c0_i32, %c0_i32_0 : i32, i32
  }
  func.func @transform_2(%arg0: i32) -> (i32, i32) {
    %c0_i32 = arith.constant 0 : i32
    %c0_i32_0 = arith.constant 0 : i32
    %c0_i32_1 = arith.constant 0 : i32
    return %c0_i32, %c0_i32_0 : i32, i32
  }
  func.func @transform_3(%arg0: i32) -> (i32, i32) {
    %c0_i32 = arith.constant 0 : i32
    %c0_i32_0 = arith.constant 0 : i32
    %c0_i32_1 = arith.constant 0 : i32
    return %c0_i32, %c0_i32_0 : i32, i32
  }
  func.func @transform_4(%arg0: i32) -> (i32, i32) {
    %c0_i32 = arith.constant 0 : i32
    %c0_i32_0 = arith.constant 0 : i32
    %c0_i32_1 = arith.constant 0 : i32
    return %c0_i32, %c0_i32_0 : i32, i32
  }
  func.func @transform_5(%arg0: i32) -> (i32, i32, i32) {
    %c0_i32 = arith.constant 0 : i32
    %c0_i32_0 = arith.constant 0 : i32
    %c0_i32_1 = arith.constant 0 : i32
    return %arg0, %c0_i32, %c0_i32_0 : i32, i32, i32
  }
}

</mosaic_0001>

<bundles_post_ra>
// kernel: tpu_custom_call.1
= control target key start
LH: loop header
LB: loop body
LE: loop exit
PB: predicated region body
PF: predicated region fallthrough
CT: control target
= control target key end

     0   :  { %10 = vsyncpa [#allocation3], 0  ;;  %s659_s0 = inlined_call_operand.hbm [shape: f32[2,32,256], index: 0, kind: input, shape index: {}]   ;;  %s660_s1 = inlined_call_operand.vmem [shape: f32[32,4], index: 1, kind: input, shape index: {}]   ;;  %s661_s2 = inlined_call_operand.vmem [shape: f32[1,4], index: 2, kind: input, shape index: {}]   ;;  %s662_s3 = inlined_call_operand.vmem [shape: f32[4,64], index: 3, kind: input, shape index: {}]   ;;  %s663_s4 = inlined_call_operand.vmem [shape: f32[1,64], index: 4, kind: input, shape index: {}]   ;;  %s664_s5 = inlined_call_operand.hbm [shape: f32[2,32,256], index: 5, kind: output, shape index: {}]  }
   0x1   :  { %11 = vsyncpa [#allocation4], 0  ;;  %s526_s18 = smov [#allocation2]  }
   0x2   :  { %s17_s19 = sshll.u32 %s526_s18, 4  ;;  %s18_s19 = int_to_ptr.vmem [resolvable:$true] %s17_s19 }
   0x3   :  { %s490_s20 = scalar_lea.vmem %s18_s19, 2048  ;;  %p495_p1 = scmp.lt.s32.totalorder %s18_s19, %s18_s19 }
   0x4   :  { %p491_p0 = scmp.ne.s32.totalorder %s18_s19, %s490_s20  ;;  %p496_p2 = scmp.lt.s32.totalorder %s490_s20, %s490_s20 }
   0x6   :  { %p497_p3 = por %p496_p2, %p495_p1 }
   0x8   :  { %p498_p4 = pnand %p497_p3, %p491_p0 }
   0xa   :  { %501 = shalt.err (!%p498_p4)
}
   0xb   :  { %s527_s21 = smov 256   ;;  %s528_s22 = smov 16  }
   0xc   :  { %23 = dma.hbm_to_vmem [thread:$0]  %s659_s0, 2048, %s18_s19, [#allocation3], %s527_s21, %s527_s21, %s528_s22  }
   0xd   :  { %522 = dma.done.wait [#allocation3], 2048  }
   0xe   :  { %523 = vsyncadd [#allocation3], 4294965248  ;;  %v568_v0 = vld [vmem:[#allocation2 + $0x40] sm:$0xff]  ;;  %v570_v1 = vld [vmem:[#allocation2 + $0x48] sm:$0xff]  ;;  %v529_v24 = vmov 0.0   ;;  %vm530_vm0 = vmmov 0   ;;  %v102_v29 = vlaneseq }
   0xf   :  { %v572_v2 = vld [vmem:[#allocation2] sm:$0xff]  ;;  %v63_v3 = vadd.f32 %v570_v1, %v568_v0  ;;  %v576_v4 = vld [vmem:[#allocation2 + $0x8] sm:$0xff]  ;;  %v578_v5 = vld [vmem:[#allocation2 + $0x50] sm:$0xff]  ;;  %458 = vmatprep.subr.mxu0 %v529_v24  ;;  %469 = vmatprep.subr.mxu1 %v529_v24  ;;  %vm113_vm1 = vcmask 130112   ;;  %vm120_vm2 = vcmask 195712   ;;  %vm127_vm3 = vcmask 261312  }
  0x10   :  { %v580_v6 = vld [vmem:[#allocation2 + $0x58] sm:$0xff]  ;;  %v51_v7 = vadd.f32 %v576_v4, %v572_v2  ;;  %v584_v8 = vld [vmem:[#allocation2 + $0x10] sm:$0xff]  ;;  %v592_v12 = vld [vmem:[#allocation2 + $0x60] sm:$0xff]  ;;  %466 = vmatprep.mubr.msk.f32.mxu0 %vm530_vm0, %v529_v24  ;;  %471 = vmatprep.mubr.msk.f32.mxu1 %vm530_vm0, %v529_v24  ;;  %v103_v31 = vand.u32 127, %v102_v29  ;;  %v105_v36 = vshrl.u32 %v102_v29, 7  ;;  %vm148_vm4 = vcmask 1041409  }
  0x11   :  { %v586_v9 = vld [vmem:[#allocation2 + $0x18] sm:$0xff]  ;;  %64 = vadd.xlane.f32.xlu1 %v63_v3  ;;  %v66_v10 = vadd.f32 %v580_v6, %v578_v5  ;;  %v594_v13 = vld [vmem:[#allocation2 + $0x68] sm:$0xff]  ;;  %v596_v14 = vld [vmem:[#allocation2 + $0x20] sm:$0xff]  ;;  %vm150_vm5 = vcmask 261120   ;;  %vm236_vm6 = vcmask 1043456   ;;  %vm232_vm7 = vcmask 31744  }
  0x12   :  { %52 = vadd.xlane.f32.xlu0 %v51_v7  ;;  %v54_v11 = vadd.f32 %v586_v9, %v584_v8  ;;  %v598_v15 = vld [vmem:[#allocation2 + $0x28] sm:$0xff]  ;;  %v69_v16 = vadd.f32 %v594_v13, %v592_v12  ;;  %v604_v18 = vld [vmem:[#allocation2 + $0x70] sm:$0xff]  ;;  %v606_v19 = vld [vmem:[#allocation2 + $0x78] sm:$0xff]  ;;  %v108_v33 = vadd.s32 4294967288, %v103_v31  ;;  %v115_v35 = vadd.s32 4294967280, %v103_v31 }
  0x13   :  { %v57_v17 = vadd.f32 %v598_v15, %v596_v14  ;;  %v608_v20 = vld [vmem:[#allocation2 + $0x30] sm:$0xff]  ;;  %v610_v21 = vld [vmem:[#allocation2 + $0x38] sm:$0xff]  ;;  %v72_v22 = vadd.f32 %v606_v19, %v604_v18  ;;  %v84_v27 = vld [vmem:[%s660_s1 + $0x8] sm:$0xff]  ;;  %v122_v40 = vadd.s32 4294967272, %v103_v31  ;;  %v106_v44 = vsub.s32 %v103_v31, %v105_v36 }
  0x14   :  { %v60_v23 = vadd.f32 %v610_v21, %v608_v20  ;;  %v86_v25 = vld [vmem:[%s660_s1 + $0x18] sm:$0xff]  ;;  %v85_v26 = vld [vmem:[%s660_s1 + $0x10] sm:$0xff]  ;;  %v83_v28 = vld [vmem:[%s660_s1] sm:$0xff]  ;;  %v111_v38 = vsub.s32 %v108_v33, %v105_v36  ;;  %v118_v42 = vsub.s32 %v115_v35, %v105_v36  ;;  %v332_v35 = vsub.s32 1, %v105_v36 }
  0x15   :  { %67 = vadd.xlane.f32.xlu1 %v66_v10  ;;  %459 = vmatpush3.msra.mxu0 %v86_v25  ;;  %v125_v51 = vsub.s32 %v122_v40, %v105_v36 }
  0x16   :  { %55 = vadd.xlane.f32.xlu0 %v54_v11  ;;  %460 = vmatprep.subr.mxu0 %v529_v24 }
  0x17   :  { %461 = vmatpush3.msra.mxu0 %v85_v26 }
  0x18   :  { %462 = vmatprep.subr.mxu0 %v529_v24 }
  0x19   :  { %70 = vadd.xlane.f32.xlu1 %v69_v16  ;;  %463 = vmatpush3.msra.mxu0 %v84_v27 }
  0x1a   :  { %58 = vadd.xlane.f32.xlu0 %v57_v17  ;;  %464 = vmatprep.subr.mxu0 %v529_v24 }
  0x1b   :  { %465 = vmatpush3.msra.mxu0 %v83_v28  ;;  %v448_v28 = vld [vmem:[%s663_s4] ss:$0 sm:$0xff] }
  0x1d   :  { %73 = vadd.xlane.f32.xlu1 %v72_v22  ;;  %v224_v22 = vld [vmem:[%s662_s3] sm:$0xf] }
  0x1e   :  { %61 = vadd.xlane.f32.xlu0 %v60_v23  ;;  %470 = vmatpush3.msk.msra.mxu1 %vm236_vm6, %v224_v22  ;;  %v446_v23 = vld [vmem:[%s661_s2] ss:$0 sm:$0xff]  ;;  %s531_s2 = smov [#allocation5]  }
  0x1f   :  { %s434_s3 = sshll.u32 %s531_s2, 4  ;;  %s435_s3 = int_to_ptr.vmem [resolvable:$true] %s434_s3 }
  0x20   :  { %s502_s4 = scalar_lea.vmem %s435_s3, 2048  ;;  %p507_p6 = scmp.lt.s32.totalorder %s435_s3, %s435_s3 }
  0x21   :  { %p503_p5 = scmp.ne.s32.totalorder %s435_s3, %s502_s4  ;;  %p508_p7 = scmp.lt.s32.totalorder %s502_s4, %s502_s4 }
  0x23   :  { %p509_p8 = por %p508_p7, %p507_p6 }
  0x25   :  { %p510_p9 = pnand %p509_p8, %p503_p5 }
  0x9a   :  { %v65_v30 = vpop.xlane.xlu1 %64 }
  0x9b   :  { %v53_v32 = vpop.xlane.xlu0 %52  ;;  %v79_v45 = vmul.f32 0.00390625, %v65_v30 }
  0x9c   :  { %v75_v48 = vmul.f32 0.00390625, %v53_v32  ;;  %v313_v32 = vsub.s32 0, %v105_v36 }
  0x9d   :  { %v132_v55 = vrot.slane %v79_v45, %v106_v44 }
  0x9e   :  { %v68_v34 = vpop.xlane.xlu1 %67  ;;  %v107_v59 = vrot.slane %v75_v48, %v106_v44 }
  0x9f   :  { %v56_v37 = vpop.xlane.xlu0 %55  ;;  %v80_v39 = vmul.f32 0.00390625, %v68_v34 }
  0xa0   :  { %v76_v41 = vmul.f32 0.00390625, %v56_v37 }
  0xa1   :  { %v136_v50 = vrot.slane %v80_v39, %v111_v38 }
  0xa2   :  { %v71_v43 = vpop.xlane.xlu1 %70  ;;  %v112_v52 = vrot.slane %v76_v41, %v111_v38 }
  0xa3   :  { %v81_v46 = vmul.f32 0.00390625, %v71_v43  ;;  %v59_v47 = vpop.xlane.xlu0 %58  ;;  %v137_v61 = vsel %vm113_vm1, %v136_v50, %v132_v55 }
  0xa4   :  { %v77_v49 = vmul.f32 0.00390625, %v59_v47  ;;  %v114_v63 = vsel %vm113_vm1, %v112_v52, %v107_v59 }
  0xa5   :  { %v141_v53 = vrot.slane %v81_v46, %v118_v42 }
  0xa6   :  { %v74_v54 = vpop.xlane.xlu1 %73  ;;  %v119_v56 = vrot.slane %v77_v49, %v118_v42 }
  0xa7   :  { %v82_v57 = vmul.f32 0.00390625, %v74_v54  ;;  %v62_v58 = vpop.xlane.xlu0 %61  ;;  %v142_v3 = vsel %vm120_vm2, %v141_v53, %v137_v61 }
  0xa8   :  { %v78_v60 = vmul.f32 0.00390625, %v62_v58  ;;  %v121_v10 = vsel %vm120_vm2, %v119_v56, %v114_v63 }
  0xa9   :  { %v146_v62 = vrot.slane %v82_v57, %v125_v51 }
  0xaa   :  { %v126_v7 = vrot.slane %v78_v60, %v125_v51 }
  0xab   :  { %v147_v11 = vsel %vm127_vm3, %v146_v62, %v142_v3 }
  0xac   :  { %v128_v16 = vsel %vm127_vm3, %v126_v7, %v121_v10 }
  0xad   :  { %v149_v17 = vsel %vm148_vm4, %v147_v11, %v128_v16 }
  0xae   :  { %467 = vmatmul.mubr.msk.f32.vlgmr.msra.gmra.mxu0 %vm150_vm5, %v149_v17 }
 0x16e   :  { %v219_v24 = vpop.f32.mrf.mxu0 }
 0x16f   :  { %v220_v25 = vadd.f32 %v446_v23, %v219_v24 }
 0x170   :  { %v468_v26 = vpop.f32.mrf.mxu0 }
 0x171   :  { %v223_v27 = vmax.f32 %v220_v25, 0.0 }
 0x173   :  { %472 = vmatmul.mubr.msk.f32.vlgmr.msra.gmra.mxu1 %vm232_vm7, %v223_v27 }
 0x233   :  { %v306_v29 = vpop.f32.mrf.mxu1 }
 0x234   :  { %v307_v30 = vadd.f32 %v448_v28, %v306_v29 }
 0x235   :  { %v473_v31 = vpop.f32.mrf.mxu1 }
 0x236   :  { %480 = vtanh.f32 %v307_v30 }
 0x243   :  { %v481_v33 = vpop.eup %480 }
 0x244   :  { %v314_v34 = vrot.slane %v481_v33, %v313_v32  ;;  %v333_v37 = vrot.slane %v481_v33, %v332_v35 }
 0x246   :  { %320 = vbcast.lane.b32.xlu1 %v314_v34, 264  ;;  %316 = vbcast.lane.b32.xlu0 %v314_v34, 256 }
 0x24a   :  { %324 = vbcast.lane.b32.xlu1 %v314_v34, 272  ;;  %335 = vbcast.lane.b32.xlu0 %v333_v37, 256 }
 0x24e   :  { %328 = vbcast.lane.b32.xlu1 %v314_v34, 280  ;;  %343 = vbcast.lane.b32.xlu0 %v333_v37, 272 }
 0x252   :  { %339 = vbcast.lane.b32.xlu1 %v333_v37, 264  ;;  %367 = vbcast.lane.b32.xlu0 %v314_v34, 288 }
 0x256   :  { %347 = vbcast.lane.b32.xlu1 %v333_v37, 280  ;;  %375 = vbcast.lane.b32.xlu0 %v314_v34, 304 }
 0x25a   :  { %371 = vbcast.lane.b32.xlu1 %v314_v34, 296  ;;  %383 = vbcast.lane.b32.xlu0 %v333_v37, 288 }
 0x25e   :  { %379 = vbcast.lane.b32.xlu1 %v314_v34, 312  ;;  %391 = vbcast.lane.b32.xlu0 %v333_v37, 304 }
 0x262   :  { %387 = vbcast.lane.b32.xlu1 %v333_v37, 296 }
 0x266   :  { %395 = vbcast.lane.b32.xlu1 %v333_v37, 312 }
 0x2b8   :  { %v321_v38 = vpop.permute.xlu1 %320  ;;  %v317_v39 = vpop.permute.xlu0 %316 }
 0x2b9   :  { %v349_v43 = vmul.f32 %v317_v39, %v572_v2  ;;  %v350_v44 = vmul.f32 %v317_v39, %v576_v4  ;;  %v351_v55 = vmul.f32 %v321_v38, %v584_v8  ;;  %v352_v2 = vmul.f32 %v321_v38, %v586_v9 }
 0x2bc   :  { %v325_v36 = vpop.permute.xlu1 %324  ;;  %v336_v40 = vpop.permute.xlu0 %335 }
 0x2bd   :  { %v353_v49 = vmul.f32 %v325_v36, %v596_v14  ;;  %v354_v50 = vmul.f32 %v325_v36, %v598_v15  ;;  %v357_v4 = vmul.f32 %v336_v40, %v568_v0  ;;  %v358_v56 = vmul.f32 %v336_v40, %v570_v1 }
 0x2c0   :  { %v329_v41 = vpop.permute.xlu1 %328  ;;  %v344_v42 = vpop.permute.xlu0 %343 }
 0x2c1   :  { %v355_v61 = vmul.f32 %v329_v41, %v608_v20  ;;  %v356_v62 = vmul.f32 %v329_v41, %v610_v21  ;;  %v361_v8 = vmul.f32 %v344_v42, %v592_v12  ;;  %v362_v9 = vmul.f32 %v344_v42, %v594_v13 }
 0x2c4   :  { %v340_v45 = vpop.permute.xlu1 %339  ;;  %v368_v46 = vpop.permute.xlu0 %367 }
 0x2c5   :  { %v397_v47 = vadd.f32 %v368_v46, %v349_v43  ;;  %v398_v48 = vadd.f32 %v368_v46, %v350_v44  ;;  %v359_v11 = vmul.f32 %v340_v45, %v578_v5  ;;  %v360_v20 = vmul.f32 %v340_v45, %v580_v6 }
 0x2c7   :  { %413 = vst [vmem:[#allocation5] sm:$0xff] %v397_v47  ;;  %414 = vst [vmem:[#allocation5 + $0x8] sm:$0xff] %v398_v48 }
 0x2c8   :  { %v348_v51 = vpop.permute.xlu1 %347  ;;  %v376_v52 = vpop.permute.xlu0 %375 }
 0x2c9   :  { %v401_v53 = vadd.f32 %v376_v52, %v353_v49  ;;  %v402_v54 = vadd.f32 %v376_v52, %v354_v50  ;;  %v363_v16 = vmul.f32 %v348_v51, %v604_v18  ;;  %v364_v17 = vmul.f32 %v348_v51, %v606_v19 }
 0x2cb   :  { %417 = vst [vmem:[#allocation5 + $0x20] sm:$0xff] %v401_v53  ;;  %418 = vst [vmem:[#allocation5 + $0x28] sm:$0xff] %v402_v54 }
 0x2cc   :  { %v372_v57 = vpop.permute.xlu1 %371  ;;  %v384_v14 = vpop.permute.xlu0 %383 }
 0x2cd   :  { %v399_v58 = vadd.f32 %v372_v57, %v351_v55  ;;  %v400_v15 = vadd.f32 %v372_v57, %v352_v2  ;;  %v405_v59 = vadd.f32 %v384_v14, %v357_v4  ;;  %v406_v60 = vadd.f32 %v384_v14, %v358_v56 }
 0x2cf   :  { %415 = vst [vmem:[#allocation5 + $0x10] sm:$0xff] %v399_v58  ;;  %416 = vst [vmem:[#allocation5 + $0x18] sm:$0xff] %v400_v15 }
 0x2d0   :  { %421 = vst [vmem:[#allocation5 + $0x40] sm:$0xff] %v405_v59  ;;  %422 = vst [vmem:[#allocation5 + $0x48] sm:$0xff] %v406_v60  ;;  %v380_v0 = vpop.permute.xlu1 %379  ;;  %v392_v1 = vpop.permute.xlu0 %391 }
 0x2d1   :  { %v403_v63 = vadd.f32 %v380_v0, %v355_v61  ;;  %v404_v3 = vadd.f32 %v380_v0, %v356_v62  ;;  %v409_v7 = vadd.f32 %v392_v1, %v361_v8  ;;  %v410_v10 = vadd.f32 %v392_v1, %v362_v9 }
 0x2d3   :  { %419 = vst [vmem:[#allocation5 + $0x30] sm:$0xff] %v403_v63  ;;  %420 = vst [vmem:[#allocation5 + $0x38] sm:$0xff] %v404_v3 }
 0x2d4   :  { %425 = vst [vmem:[#allocation5 + $0x60] sm:$0xff] %v409_v7  ;;  %426 = vst [vmem:[#allocation5 + $0x68] sm:$0xff] %v410_v10  ;;  %v388_v12 = vpop.permute.xlu1 %387 }
 0x2d5   :  { %v407_v13 = vadd.f32 %v388_v12, %v359_v11  ;;  %v408_v21 = vadd.f32 %v388_v12, %v360_v20 }
 0x2d7   :  { %423 = vst [vmem:[#allocation5 + $0x50] sm:$0xff] %v407_v13  ;;  %424 = vst [vmem:[#allocation5 + $0x58] sm:$0xff] %v408_v21 }
 0x2d8   :  { %v396_v22 = vpop.permute.xlu1 %395 }
 0x2d9   :  { %v411_v23 = vadd.f32 %v396_v22, %v363_v16  ;;  %v412_v5 = vadd.f32 %v396_v22, %v364_v17 }
 0x2db   :  { %427 = vst [vmem:[#allocation5 + $0x70] sm:$0xff] %v411_v23  ;;  %428 = vst [vmem:[#allocation5 + $0x78] sm:$0xff] %v412_v5 }
 0x2dc   :  { %513 = shalt.err (!%p510_p9)
}
 0x2dd   :  { %440 = dma.vmem_to_hbm [thread:$0]  %s435_s3, 2048, %s664_s5, [#allocation4], %s527_s21, %s527_s21, %s528_s22  }
 0x2de   :  { %524 = dma.done.wait [#allocation4], 2048  }
 0x2df   :  { %525 = vsyncadd [#allocation4], 4294965248 }
 0x2e0   :  { %444 = vsyncpa [#allocation3], 1 }
 0x2e1   :  { %445 = vsyncpa [#allocation4], 1 }

</bundles_post_ra>
